<compile_context>
chip_gen: v6e
topology: v6e:2x2x1
jax: 0.10.0
libtpu: 0.0.40
codegen_flags: <defaults>
</compile_context>

<pallas_src>
import math

import jax
import jax.numpy as jnp
from jax.experimental import pallas as pl
from jax.experimental.pallas import tpu as pltpu


def _round_up(x, m):
    return ((x + m - 1) // m) * m


def _pick_tile(dim_pad, unit, cap):
    """Largest multiple of `unit` that divides dim_pad and is <= cap."""
    best = unit
    t = unit
    while t <= min(dim_pad, cap):
        if dim_pad % t == 0:
            best = t
        t += unit
    return best


def _shrink_tile(dim_pad, tile):
    """Next smaller multiple of 128 dividing dim_pad (or `tile` if none)."""
    t = tile - 128
    while t >= 128 and dim_pad % t:
        t -= 128
    return t if t >= 128 else tile


def _vmem_capacity_bytes():
    try:
        info = pltpu.get_tpu_info()
        for attr in ("vmem_capacity_bytes", "vmem_bytes", "vmem_size_bytes"):
            v = getattr(info, attr, None)
            if isinstance(v, int) and v > 0:
                return v
    except Exception:
        pass
    return 64 * 1024 * 1024   # conservative (v7x per-TC)


def _vmem_estimate(resident, B_pad, I_pad, tm, tn, tk, in_bytes):
    """Rough double-buffered working-set size in bytes."""
    est = 0
    if resident:
        est += 2 * 2 * B_pad * I_pad * in_bytes        # xm, xv (whole, worst case 2 bufs)
    else:
        est += 2 * 2 * tm * tk * in_bytes              # xm, xv tiles, double-buffered
    est += 2 * tk * tn * in_bytes                      # weight tile, double-buffered
    est += 2 * 2 * tm * tn * 4                         # two f32 output tiles, double-buffered
    est += 2 * tm * tn * 4                             # two f32 accumulators
    est += 2 * (tm * 4 + 2 * tn * 4)                   # t1 / b / bv (tiny)
    return est


def _make_linear_mfs_kernel(resident_inputs):
    def kernel(xm_ref, xv_ref, t1_ref, w_ref, b_ref, bv_ref,
               om_ref, ov_ref, om_acc, ov_acc):
        """One (i, j, k) grid step.

        resident_inputs=True : xm_ref/xv_ref are (K, tm, tk), VMEM-resident for
                               the whole grid (constant index map); slice [k].
        resident_inputs=False: xm_ref/xv_ref are (tm, tk) streamed per (i, k).
        w_ref  : (tk, tn)  weight, pre-transposed to (I, O) layout
        t1_ref : (tm, 1)   f32   precomputed sum_i((xm^2 + xv) * exp(wv))
        b_ref  : (1, tn)   f32   bias
        bv_ref : (1, tn)   f32   bias log-variance
        """
        k = pl.program_id(2)

        @pl.when(k == 0)
        def _init():
            om_acc[...] = jnp.zeros_like(om_acc)
            ov_acc[...] = jnp.zeros_like(ov_acc)

        if resident_inputs:
            xm = xm_ref[k]                 # (tm, tk)
            xv = xv_ref[k]
        else:
            xm = xm_ref[...]               # (tm, tk)
            xv = xv_ref[...]

        w = w_ref[...]                     # (tk, tn), matmul dtype (bf16 default)

        # outputs_mean partial: xm @ W.T  (MXU, f32 accumulation)
        om_acc[...] += jnp.dot(xm, w, preferred_element_type=jnp.float32)

        # outputs_variance partial: xv @ (W^2).T ; exp(wv) terms live in t1 (f32)
        ov_acc[...] += jnp.dot(xv, w * w, preferred_element_type=jnp.float32)

        @pl.when(k == pl.num_programs(2) - 1)
        def _finalize():
            om_ref[...] = (om_acc[...] + b_ref[...]).astype(om_ref.dtype)
            ov_ref[...] = (ov_acc[...] + t1_ref[...]
                           + jnp.exp(bv_ref[...])).astype(ov_ref.dtype)

    return kernel


def linear_mfs_forward(inputs_mean, inputs_variance, weight, weight_variance,
                       bias, bias_variance, *, matmul_dtype=jnp.bfloat16):
    """Forward pass of LinearMFS.

    matmul_dtype: streaming / MXU dtype for xm, xv, W (accumulation is always
    f32). Pass jnp.float32 for a full-precision fallback on the matmul paths.
    """
    f32 = jnp.float32
    B, I = inputs_mean.shape
    O = weight.shape[0]
    in_bytes = jnp.dtype(matmul_dtype).itemsize

    # ---- chip-aware caps ----------------------------------------------------
    vmem_cap = _vmem_capacity_bytes()
    if vmem_cap >= 128 * 1024 * 1024:          # v5e / v6e: plenty of VMEM
        tk_cap = 1024
        vmem_limit = 96 * 1024 * 1024
    else:                                      # v7x (64 MiB/TC) or unknown: be conservative
        tk_cap = 512
        vmem_limit = 48 * 1024 * 1024
    budget = vmem_limit - 8 * 1024 * 1024
    tm_cap, tn_cap = 512, 512

    # ---- pad dims to the lane/sublane grain, then pick tiles dividing them --
    I_pad = _round_up(I, 128)
    O_pad = _round_up(O, 128)
    if B <= tm_cap:
        B_pad = _round_up(B, 16)               # 16: bf16 sublane packing
        tm = B_pad
    else:
        B_pad = _round_up(B, 128)
        tm = _pick_tile(B_pad, 128, tm_cap)
    tn = _pick_tile(O_pad, 128, tn_cap)
    tk = _pick_tile(I_pad, 128, tk_cap)

    # v7x megacore: keep >= 2 j-tiles when the batch is a single i-tile
    if B_pad == tm and O_pad // tn < 2 and O_pad >= 256:
        tn = _pick_tile(O_pad, 128, O_pad // 2)

    # keep xm/xv fully VMEM-resident when small and a single i-tile
    resident = (B_pad == tm
                and 2 * B_pad * I_pad * in_bytes <= 8 * 1024 * 1024)

    # shrink tk until the working set fits the VMEM budget (rarely triggers)
    while (_vmem_estimate(resident, B_pad, I_pad, tm, tn, tk, in_bytes) > budget
           and tk > 128):
        new_tk = _shrink_tile(I_pad, tk)
        if new_tk == tk:
            break
        tk = new_tk

    gi, gj, gk = B_pad // tm, O_pad // tn, I_pad // tk

    # ---- build padded operands ----------------------------------------------
    xm = jnp.pad(inputs_mean.astype(matmul_dtype),
                 ((0, B_pad - B), (0, I_pad - I)))
    xv = jnp.pad(inputs_variance.astype(matmul_dtype),
                 ((0, B_pad - B), (0, I_pad - I)))
    w_t = jnp.pad(jnp.transpose(weight).astype(matmul_dtype),
                  ((0, I_pad - I), (0, O_pad - O)))            # (I_pad, O_pad)

    # j-invariant term, computed once in f32 (keeps exp(wv) out of bf16 matmuls)
    exp_wv = jnp.exp(weight_variance.astype(f32))              # (I,)
    t1 = jnp.sum((inputs_mean.astype(f32) ** 2
                  + inputs_variance.astype(f32)) * exp_wv[None, :],
                 axis=-1, keepdims=True)                       # (B, 1)
    t1 = jnp.pad(t1, ((0, B_pad - B), (0, 0)))

    b = jnp.pad(bias.astype(f32).reshape(1, O), ((0, 0), (0, O_pad - O)))
    bv = jnp.pad(bias_variance.astype(f32).reshape(1, O),
                 ((0, 0), (0, O_pad - O)), constant_values=-30.0)

    if resident:
        # (K, B_pad, tk) layout: fetched to VMEM once, kernel indexes [k]
        xm_in = xm.reshape(B_pad, gk, tk).swapaxes(0, 1)
        xv_in = xv.reshape(B_pad, gk, tk).swapaxes(0, 1)
        xm_spec = pl.BlockSpec((gk, B_pad, tk), lambda i, j, k: (0, 0, 0))
        xv_spec = pl.BlockSpec((gk, B_pad, tk), lambda i, j, k: (0, 0, 0))
    else:
        xm_in, xv_in = xm, xv
        xm_spec = pl.BlockSpec((tm, tk), lambda i, j, k: (i, k))
        xv_spec = pl.BlockSpec((tm, tk), lambda i, j, k: (i, k))

    t1_spec = pl.BlockSpec((tm, 1), lambda i, j, k: (i, 0))
    # NOTE: pipeline_mode=pl.Buffered(3) on the weight spec only helps once
    # compute-bound; left at the default (measure before enabling).
    w_spec = pl.BlockSpec((tk, tn), lambda i, j, k: (k, j))
    b_spec = pl.BlockSpec((1, tn), lambda i, j, k: (0, j))
    bv_spec = pl.BlockSpec((1, tn), lambda i, j, k: (0, j))
    out_spec = pl.BlockSpec((tm, tn), lambda i, j, k: (i, j))

    out_m, out_v = pl.pallas_call(
        _make_linear_mfs_kernel(resident),
        out_shape=(jax.ShapeDtypeStruct((B_pad, O_pad), f32),
                   jax.ShapeDtypeStruct((B_pad, O_pad), f32)),
        grid_spec=pltpu.PrefetchScalarGridSpec(
            num_scalar_prefetch=0,
            grid=(gi, gj, gk),
            in_specs=[xm_spec, xv_spec, t1_spec, w_spec, b_spec, bv_spec],
            out_specs=(out_spec, out_spec),
            scratch_shapes=[
                pltpu.VMEM((tm, tn), f32),   # outputs_mean accumulator
                pltpu.VMEM((tm, tn), f32),   # outputs_variance accumulator
            ],
        ),
        compiler_params=pltpu.CompilerParams(
            dimension_semantics=("parallel", "parallel", "arbitrary"),
            vmem_limit_bytes=vmem_limit,
        ),
    )(xm_in, xv_in, t1, w_t, b, bv)

    return out_m[:B, :O], out_v[:B, :O]


if __name__ == "__main__":
    key = jax.random.PRNGKey(0)
    B, in_features, out_features = 8, 32, 16
    prior_precision = 1.0
    log_var_init = math.log(1.0 / prior_precision)

    k1, k2, k3, k4 = jax.random.split(key, 4)
    # Deterministic synthetic parameter init (module __init__ gives shapes).
    weight = jax.random.normal(k1, (out_features, in_features), jnp.float32) * (
        1.0 / math.sqrt(in_features))
    bias = jax.random.normal(k2, (out_features,), jnp.float32) * 0.1
    weight_variance = jnp.ones((in_features,), jnp.float32) * log_var_init
    bias_variance = jnp.ones((out_features,), jnp.float32) * log_var_init

    inputs_mean = jax.random.normal(k3, (B, in_features), jnp.float32)
    inputs_variance = jax.nn.softplus(
        jax.random.normal(k4, (B, in_features), jnp.float32))

    out_mean, out_var = linear_mfs_forward(
        inputs_mean, inputs_variance, weight, weight_variance, bias,
        bias_variance)
    jax.block_until_ready((out_mean, out_var))

    # Pure-JAX f32 reference (kernel matmuls run in bf16 with f32 accumulation
    # -> bf16-appropriate tolerances; the exp(wv) terms are exact f32 in-kernel).
    ref_mean = inputs_mean @ weight.T + bias
    ref_var = ((inputs_mean ** 2 * jnp.exp(weight_variance))
               @ jnp.ones_like(weight).T
               + inputs_variance @ (weight ** 2
                                    + jnp.exp(weight_variance)[None, :]).T
               + jnp.exp(bias_variance))
    assert out_mean.shape == ref_mean.shape and out_var.shape == ref_var.shape
    assert jnp.allclose(out_mean, ref_mean, atol=5e-2, rtol=5e-2)
    assert jnp.allclose(out_var, ref_var, atol=5e-2, rtol=5e-2)

    print("KERNEL_OK")
</pallas_src>

<mosaic_0001>
module attributes {stable_mosaic.version = 11 : i64} {
  func.func @kernel(%arg0: i32, %arg1: i32, %arg2: i32, %arg3: memref<1x16x128xbf16, #tpu.memory_space<vmem>>, %arg4: memref<1x16x128xbf16, #tpu.memory_space<vmem>>, %arg5: memref<16x1xf32, #tpu.memory_space<vmem>>, %arg6: memref<128x128xbf16, #tpu.memory_space<vmem>>, %arg7: memref<1x128xf32, #tpu.memory_space<vmem>>, %arg8: memref<1x128xf32, #tpu.memory_space<vmem>>, %arg9: memref<16x128xf32, #tpu.memory_space<vmem>>, %arg10: memref<16x128xf32, #tpu.memory_space<vmem>>, %arg11: memref<16x128xf32, #tpu.memory_space<vmem>>, %arg12: memref<16x128xf32, #tpu.memory_space<vmem>>) attributes {dimension_semantics = [#tpu.dimension_semantics<parallel>, #tpu.dimension_semantics<parallel>, #tpu.dimension_semantics<arbitrary>], iteration_bounds = array<i64: 1, 1, 1>, scalar_prefetch = 0 : i64, scratch_operands = 2 : i64, tpu.core_type = #tpu.core_type<tc>, window_params = [{pipeline_mode = #tpu.pipeline_mode<synchronous>, transform_indices = @transform_0, window_bounds = array<i64: 1, 16, 128>}, {pipeline_mode = #tpu.pipeline_mode<synchronous>, transform_indices = @transform_1, window_bounds = array<i64: 1, 16, 128>}, {transform_indices = @transform_2, window_bounds = array<i64: 16, 1>}, {transform_indices = @transform_3, window_bounds = array<i64: 128, 128>}, {transform_indices = @transform_4, window_bounds = array<i64: 1, 128>}, {transform_indices = @transform_5, window_bounds = array<i64: 1, 128>}, {transform_indices = @transform_6, window_bounds = array<i64: 16, 128>}, {transform_indices = @transform_7, window_bounds = array<i64: 16, 128>}]} {
    %c0_i32 = arith.constant 0 : i32
    %0 = arith.cmpi eq, %arg2, %c0_i32 : i32
    %1 = arith.extui %0 : i1 to i32
    %c0_i32_0 = arith.constant 0 : i32
    %2 = arith.cmpi ne, %1, %c0_i32_0 : i32
    scf.if %2 {
      %cst_17 = arith.constant 0.000000e+00 : f32
      %22 = vector.broadcast %cst_17 : f32 to vector<16x128xf32>
      %c0_18 = arith.constant 0 : index
      %c0_19 = arith.constant 0 : index
      %23 = vector.load %arg11[%c0_18, %c0_19] : memref<16x128xf32, #tpu.memory_space<vmem>>, vector<16x128xf32>
      tpu.vector_store %arg11[%c0_18, %c0_19], %22 {strides = array<i32>} : memref<16x128xf32, #tpu.memory_space<vmem>>, vector<16x128xf32>,
      %cst_20 = arith.constant 0.000000e+00 : f32
      %24 = vector.broadcast %cst_20 : f32 to vector<16x128xf32>
      %c0_21 = arith.constant 0 : index
      %c0_22 = arith.constant 0 : index
      %25 = vector.load %arg12[%c0_21, %c0_22] : memref<16x128xf32, #tpu.memory_space<vmem>>, vector<16x128xf32>
      tpu.vector_store %arg12[%c0_21, %c0_22], %24 {strides = array<i32>} : memref<16x128xf32, #tpu.memory_space<vmem>>, vector<16x128xf32>,
    } else {
    }
    %3 = arith.index_cast %arg2 : i32 to index
    %c0 = arith.constant 0 : index
    %c0_1 = arith.constant 0 : index
    %4 = vector.load %arg3[%3, %c0, %c0_1] : memref<1x16x128xbf16, #tpu.memory_space<vmem>>, vector<1x16x128xbf16>
    %5 = vector.shape_cast %4 : vector<1x16x128xbf16> to vector<16x128xbf16>
    %6 = arith.index_cast %arg2 : i32 to index
    %c0_2 = arith.constant 0 : index
    %c0_3 = arith.constant 0 : index
    %7 = vector.load %arg4[%6, %c0_2, %c0_3] : memref<1x16x128xbf16, #tpu.memory_space<vmem>>, vector<1x16x128xbf16>
    %8 = vector.shape_cast %7 : vector<1x16x128xbf16> to vector<16x128xbf16>
    %c0_4 = arith.constant 0 : index
    %c0_5 = arith.constant 0 : index
    %9 = vector.load %arg6[%c0_4, %c0_5] : memref<128x128xbf16, #tpu.memory_space<vmem>>, vector<128x128xbf16>
    %c0_6 = arith.constant 0 : index
    %c0_7 = arith.constant 0 : index
    %10 = vector.load %arg11[%c0_6, %c0_7] : memref<16x128xf32, #tpu.memory_space<vmem>>, vector<16x128xf32>
    %cst = arith.constant dense<0.000000e+00> : vector<16x128xf32>
    %11 = tpu.matmul %5, %9, %cst {dimension_numbers = #tpu.dot_dimension_numbers<[1], [0], [0], [1], [0, 0, 1, 1], [], []>} : vector<16x128xbf16>, vector<128x128xbf16>, vector<16x128xf32> -> vector<16x128xf32>
    %12 = arith.addf %10, %11 : vector<16x128xf32>
    %c0_8 = arith.constant 0 : index
    %c0_9 = arith.constant 0 : index
    %13 = vector.load %arg11[%c0_8, %c0_9] : memref<16x128xf32, #tpu.memory_space<vmem>>, vector<16x128xf32>
    tpu.vector_store %arg11[%c0_8, %c0_9], %12 {strides = array<i32>} : memref<16x128xf32, #tpu.memory_space<vmem>>, vector<16x128xf32>,
    %c0_10 = arith.constant 0 : index
    %c0_11 = arith.constant 0 : index
    %14 = vector.load %arg12[%c0_10, %c0_11] : memref<16x128xf32, #tpu.memory_space<vmem>>, vector<16x128xf32>
    %15 = arith.mulf %9, %9 : vector<128x128xbf16>
    %cst_12 = arith.constant dense<0.000000e+00> : vector<16x128xf32>
    %16 = tpu.matmul %8, %15, %cst_12 {dimension_numbers = #tpu.dot_dimension_numbers<[1], [0], [0], [1], [0, 0, 1, 1], [], []>} : vector<16x128xbf16>, vector<128x128xbf16>, vector<16x128xf32> -> vector<16x128xf32>
    %17 = arith.addf %14, %16 : vector<16x128xf32>
    %c0_13 = arith.constant 0 : index
    %c0_14 = arith.constant 0 : index
    %18 = vector.load %arg12[%c0_13, %c0_14] : memref<16x128xf32, #tpu.memory_space<vmem>>, vector<16x128xf32>
    tpu.vector_store %arg12[%c0_13, %c0_14], %17 {strides = array<i32>} : memref<16x128xf32, #tpu.memory_space<vmem>>, vector<16x128xf32>,
    %c0_i32_15 = arith.constant 0 : i32
    %19 = arith.cmpi eq, %arg2, %c0_i32_15 : i32
    %20 = arith.extui %19 : i1 to i32
    %c0_i32_16 = arith.constant 0 : i32
    %21 = arith.cmpi ne, %20, %c0_i32_16 : i32
    scf.if %21 {
      %c0_17 = arith.constant 0 : index
      %c0_18 = arith.constant 0 : index
      %22 = vector.load %arg11[%c0_17, %c0_18] : memref<16x128xf32, #tpu.memory_space<vmem>>, vector<16x128xf32>
      %c0_19 = arith.constant 0 : index
      %c0_20 = arith.constant 0 : index
      %23 = vector.load %arg7[%c0_19, %c0_20] : memref<1x128xf32, #tpu.memory_space<vmem>>, vector<1x128xf32>
      %24 = vector.broadcast %23 : vector<1x128xf32> to vector<16x128xf32>
      %25 = arith.addf %22, %24 : vector<16x128xf32>
      %c0_21 = arith.constant 0 : index
      %c0_22 = arith.constant 0 : index
      %26 = vector.load %arg9[%c0_21, %c0_22] : memref<16x128xf32, #tpu.memory_space<vmem>>, vector<16x128xf32>
      tpu.vector_store %arg9[%c0_21, %c0_22], %25 {strides = array<i32>} : memref<16x128xf32, #tpu.memory_space<vmem>>, vector<16x128xf32>,
      %c0_23 = arith.constant 0 : index
      %c0_24 = arith.constant 0 : index
      %27 = vector.load %arg12[%c0_23, %c0_24] : memref<16x128xf32, #tpu.memory_space<vmem>>, vector<16x128xf32>
      %c0_25 = arith.constant 0 : index
      %c0_26 = arith.constant 0 : index
      %28 = vector.load %arg5[%c0_25, %c0_26] : memref<16x1xf32, #tpu.memory_space<vmem>>, vector<16x1xf32>
      %29 = vector.broadcast %28 : vector<16x1xf32> to vector<16x128xf32>
      %30 = arith.addf %27, %29 : vector<16x128xf32>
      %c0_27 = arith.constant 0 : index
      %c0_28 = arith.constant 0 : index
      %31 = vector.load %arg8[%c0_27, %c0_28] : memref<1x128xf32, #tpu.memory_space<vmem>>, vector<1x128xf32>
      %32 = math.exp %31 : vector<1x128xf32>
      %33 = vector.broadcast %32 : vector<1x128xf32> to vector<16x128xf32>
      %34 = arith.addf %30, %33 : vector<16x128xf32>
      %c0_29 = arith.constant 0 : index
      %c0_30 = arith.constant 0 : index
      %35 = vector.load %arg10[%c0_29, %c0_30] : memref<16x128xf32, #tpu.memory_space<vmem>>, vector<16x128xf32>
      tpu.vector_store %arg10[%c0_29, %c0_30], %34 {strides = array<i32>} : memref<16x128xf32, #tpu.memory_space<vmem>>, vector<16x128xf32>,
    } else {
    }
    return
  }
  func.func @transform_0(%arg0: i32, %arg1: i32, %arg2: i32) -> (i32, i32, i32) {
    %c0_i32 = arith.constant 0 : i32
    %c0_i32_0 = arith.constant 0 : i32
    %c0_i32_1 = arith.constant 0 : i32
    %c0_i32_2 = arith.constant 0 : i32
    return %c0_i32, %c0_i32_0, %c0_i32_1 : i32, i32, i32
  }
  func.func @transform_1(%arg0: i32, %arg1: i32, %arg2: i32) -> (i32, i32, i32) {
    %c0_i32 = arith.constant 0 : i32
    %c0_i32_0 = arith.constant 0 : i32
    %c0_i32_1 = arith.constant 0 : i32
    %c0_i32_2 = arith.constant 0 : i32
    return %c0_i32, %c0_i32_0, %c0_i32_1 : i32, i32, i32
  }
  func.func @transform_2(%arg0: i32, %arg1: i32, %arg2: i32) -> (i32, i32) {
    %c0_i32 = arith.constant 0 : i32
    %c0_i32_0 = arith.constant 0 : i32
    return %arg0, %c0_i32 : i32, i32
  }
  func.func @transform_3(%arg0: i32, %arg1: i32, %arg2: i32) -> (i32, i32) {
    %c0_i32 = arith.constant 0 : i32
    return %arg2, %arg1 : i32, i32
  }
  func.func @transform_4(%arg0: i32, %arg1: i32, %arg2: i32) -> (i32, i32) {
    %c0_i32 = arith.constant 0 : i32
    %c0_i32_0 = arith.constant 0 : i32
    return %c0_i32, %arg1 : i32, i32
  }
  func.func @transform_5(%arg0: i32, %arg1: i32, %arg2: i32) -> (i32, i32) {
    %c0_i32 = arith.constant 0 : i32
    %c0_i32_0 = arith.constant 0 : i32
    return %c0_i32, %arg1 : i32, i32
  }
  func.func @transform_6(%arg0: i32, %arg1: i32, %arg2: i32) -> (i32, i32) {
    %c0_i32 = arith.constant 0 : i32
    return %arg0, %arg1 : i32, i32
  }
  func.func @transform_7(%arg0: i32, %arg1: i32, %arg2: i32) -> (i32, i32) {
    %c0_i32 = arith.constant 0 : i32
    return %arg0, %arg1 : i32, i32
  }
}

</mosaic_0001>

<bundles_post_ra>
// kernel: tpu_custom_call.1
= control target key start
LH: loop header
LB: loop body
LE: loop exit
PB: predicated region body
PF: predicated region fallthrough
CT: control target
= control target key end

     0   :  { %13 = vsyncpa [#allocation5], 0  ;;  %s632_s0 = inlined_call_operand.vmem [shape: bf16[1,16,128], index: 0, kind: input, shape index: {}]   ;;  %s633_s1 = inlined_call_operand.vmem [shape: bf16[1,16,128], index: 1, kind: input, shape index: {}]   ;;  %s634_s2 = inlined_call_operand.vmem [shape: f32[16,1], index: 2, kind: input, shape index: {}]   ;;  %s635_s3 = inlined_call_operand.hbm [shape: bf16[128,128], index: 3, kind: input, shape index: {}]   ;;  %s636_s4 = inlined_call_operand.vmem [shape: f32[1,128], index: 4, kind: input, shape index: {}]   ;;  %s637_s5 = inlined_call_operand.vmem [shape: f32[1,128], index: 5, kind: input, shape index: {}]   ;;  %s638_s6 = inlined_call_operand.hbm [shape: f32[16,128], index: 6, kind: output, shape index: {0}]   ;;  %s639_s7 = inlined_call_operand.hbm [shape: f32[16,128], index: 7, kind: output, shape index: {1}]  }
   0x1   :  { %14 = vsyncpa [#allocation6], 0 }
   0x2   :  { %15 = vsyncpa [#allocation9], 0  ;;  %s537_s24 = smov [#allocation4]  }
   0x3   :  { %s27_s25 = sshll.u32 %s537_s24, 4  ;;  %s28_s25 = int_to_ptr.vmem [resolvable:$true] %s27_s25 }
   0x4   :  { %s479_s26 = scalar_lea.vmem %s28_s25, 1024  ;;  %p484_p1 = scmp.lt.s32.totalorder %s28_s25, %s28_s25 }
   0x5   :  { %p480_p0 = scmp.ne.s32.totalorder %s28_s25, %s479_s26  ;;  %p485_p2 = scmp.lt.s32.totalorder %s479_s26, %s479_s26 }
   0x7   :  { %p486_p3 = por %p485_p2, %p484_p1 }
   0x9   :  { %p487_p4 = pnand %p486_p3, %p480_p0 }
   0xb   :  { %490 = shalt.err (!%p487_p4)
}
   0xc   :  { %s538_s27 = smov 64   ;;  %s539_s28 = smov 4  }
   0xd   :  { %33 = dma.hbm_to_vmem [thread:$0]  %s635_s3, 1024, %s28_s25, [#allocation5], %s538_s27, %s538_s27, %s539_s28  }
   0xe   :  { %531 = dma.done.wait [#allocation5], 1024  }
   0xf   :  { %532 = vsyncadd [#allocation5], 4294966272  ;;  %v540_v0 = vmov 0.0   ;;  %vm541_vm0 = vmmov 0   ;;  %v542_v1 = vmov 0   ;;  %v311_v21 = vld [vmem:[%s634_s2] sm:$0xff]  ;;  %v329_v56 = vlaneseq }
  0x10   :  { %408 = vmatprep.subr.bf16.mxu0 %v540_v0  ;;  %428 = vmatprep.subr.bf16.mxu1 %v540_v0  ;;  %v73_v2 = vld [vmem:[#allocation4 + $0x38] sm:$0xf]  ;;  %v74_v3 = vld [vmem:[#allocation4 + $0x3c] sm:$0xf]  ;;  %v71_v4 = vld [vmem:[#allocation4 + $0x30] sm:$0xf] }
  0x11   :  { %424 = vmatprep.mubr.msk.bf16.mxu0 %vm541_vm0, %v540_v0  ;;  %444 = vmatprep.mubr.msk.bf16.mxu1 %vm541_vm0, %v540_v0  ;;  %v379_v5 = vcombine.low %v73_v2, %v74_v3  ;;  %v192_v6 = vmul.bf16 %v73_v2, %v73_v2  ;;  %v193_v7 = vmul.bf16 %v74_v3, %v74_v3  ;;  %v72_v8 = vld [vmem:[#allocation4 + $0x34] sm:$0xf]  ;;  %v69_v11 = vld [vmem:[#allocation4 + $0x28] sm:$0xf]  ;;  %v70_v12 = vld [vmem:[#allocation4 + $0x2c] sm:$0xf] }
  0x12   :  { %458 = vset.pattern.permute.xlu0 %v542_v1  ;;  %v190_v9 = vmul.bf16 %v71_v4, %v71_v4  ;;  %v191_v10 = vmul.bf16 %v72_v8, %v72_v8  ;;  %v378_v14 = vcombine.low %v71_v4, %v72_v8  ;;  %v188_v16 = vmul.bf16 %v69_v11, %v69_v11  ;;  %v67_v18 = vld [vmem:[#allocation4 + $0x20] sm:$0xf]  ;;  %v68_v19 = vld [vmem:[#allocation4 + $0x24] sm:$0xf]  ;;  %v312_v25 = vld [vmem:[%s634_s2 + $0x8] sm:$0xff] }
  0x13   :  { %409 = vmatpush3.bf16.msra.mxu0 %v379_v5  ;;  %v388_v13 = vcombine.low %v192_v6, %v193_v7  ;;  %v189_v17 = vmul.bf16 %v70_v12, %v70_v12  ;;  %v377_v20 = vcombine.low %v69_v11, %v70_v12  ;;  %315 = vperm.xlu0 %458, %v311_v21   ;;  %v65_v26 = vld [vmem:[#allocation4 + $0x18] sm:$0xf]  ;;  %v66_v27 = vld [vmem:[#allocation4 + $0x1c] sm:$0xf]  ;;  %v63_v32 = vld [vmem:[#allocation4 + $0x10] sm:$0xf] }
  0x14   :  { %410 = vmatprep.subr.bf16.mxu0 %v540_v0  ;;  %v387_v15 = vcombine.low %v190_v9, %v191_v10  ;;  %v186_v23 = vmul.bf16 %v67_v18, %v67_v18  ;;  %v187_v24 = vmul.bf16 %v68_v19, %v68_v19  ;;  %v376_v28 = vcombine.low %v67_v18, %v68_v19  ;;  %v64_v33 = vld [vmem:[#allocation4 + $0x14] sm:$0xf]  ;;  %v61_v38 = vld [vmem:[#allocation4 + $0x8] sm:$0xf]  ;;  %v62_v39 = vld [vmem:[#allocation4 + $0xc] sm:$0xf] }
  0x15   :  { %429 = vmatpush3.bf16.msra.mxu1 %v388_v13  ;;  %v386_v22 = vcombine.low %v188_v16, %v189_v17  ;;  %v184_v30 = vmul.bf16 %v65_v26, %v65_v26  ;;  %v185_v31 = vmul.bf16 %v66_v27, %v66_v27  ;;  %v375_v34 = vcombine.low %v65_v26, %v66_v27  ;;  %v59_v44 = vld [vmem:[#allocation4] sm:$0xf]  ;;  %v60_v45 = vld [vmem:[#allocation4 + $0x4] sm:$0xf] }
  0x16   :  { %430 = vmatprep.subr.bf16.mxu1 %v540_v0  ;;  %v385_v29 = vcombine.low %v186_v23, %v187_v24  ;;  %v182_v36 = vmul.bf16 %v63_v32, %v63_v32  ;;  %v183_v37 = vmul.bf16 %v64_v33, %v64_v33  ;;  %v374_v40 = vcombine.low %v63_v32, %v64_v33  ;;  %v467_v52 = vld [vmem:[%s632_s0] sm:$0xff]  }
  0x17   :  { %411 = vmatpush3.bf16.msra.mxu0 %v378_v14  ;;  %320 = vperm.xlu0 %458, %v312_v25   ;;  %v384_v35 = vcombine.low %v184_v30, %v185_v31  ;;  %v180_v42 = vmul.bf16 %v61_v38, %v61_v38  ;;  %v181_v43 = vmul.bf16 %v62_v39, %v62_v39  ;;  %v468_v53 = vld [vmem:[%s633_s1] sm:$0xff]   ;;  %v330_v57 = vshrl.u32 %v329_v56, 7  ;;  %s543_s1 = smov [#allocation7]  }
  0x18   :  { %412 = vmatprep.subr.bf16.mxu0 %v540_v0  ;;  %v383_v41 = vcombine.low %v182_v36, %v183_v37  ;;  %v373_v46 = vcombine.low %v61_v38, %v62_v39  ;;  %v178_v48 = vmul.bf16 %v59_v44, %v59_v44  ;;  %v179_v49 = vmul.bf16 %v60_v45, %v60_v45  ;;  %v325_v54 = vld [vmem:[%s637_s5] sm:$0x1]  ;;  %s343_s17 = sshll.u32 %s543_s1, 4  ;;  %s544_s5 = smov [#allocation8]   ;;  %s344_s17 = int_to_ptr.vmem [resolvable:$true] %s343_s17 }
  0x19   :  { %431 = vmatpush3.bf16.msra.mxu1 %v387_v15  ;;  %v382_v47 = vcombine.low %v180_v42, %v181_v43  ;;  %v372_v50 = vcombine.low %v59_v44, %v60_v45  ;;  %v326_v55 = vmul.f32 1.442695, %v325_v54  ;;  %v331_v58 = vsub.s32 0, %v330_v57  ;;  %v389_v60 = vld [vmem:[%s636_s4] ss:$0 sm:$0xff]  ;;  %s355_s4 = sshll.u32 %s544_s5, 4  ;;  %p496_p6 = scmp.lt.s32.totalorder %s344_s17, %s344_s17  ;;  %s356_s4 = int_to_ptr.vmem [resolvable:$true] %s355_s4 }
  0x1a   :  { %432 = vmatprep.subr.bf16.mxu1 %v540_v0  ;;  %v381_v51 = vcombine.low %v178_v48, %v179_v49  ;;  %s491_s18 = scalar_lea.vmem %s344_s17, 256 }
  0x1b   :  { %413 = vmatpush3.bf16.msra.mxu0 %v377_v20  ;;  %469 = vpow2.f32 %v326_v55  ;;  %p492_p5 = scmp.ne.s32.totalorder %s344_s17, %s491_s18  ;;  %p497_p7 = scmp.lt.s32.totalorder %s491_s18, %s491_s18 }
  0x1c   :  { %414 = vmatprep.subr.bf16.mxu0 %v540_v0 }
  0x1d   :  { %433 = vmatpush3.bf16.msra.mxu1 %v386_v22  ;;  %p498_p8 = por %p497_p7, %p496_p6 }
  0x1e   :  { %434 = vmatprep.subr.bf16.mxu1 %v540_v0 }
  0x1f   :  { %415 = vmatpush3.bf16.msra.mxu0 %v376_v28  ;;  %p499_p9 = pnand %p498_p8, %p492_p5 }
  0x20   :  { %416 = vmatprep.subr.bf16.mxu0 %v540_v0 }
  0x21   :  { %435 = vmatpush3.bf16.msra.mxu1 %v385_v29 }
  0x22   :  { %436 = vmatprep.subr.bf16.mxu1 %v540_v0 }
  0x23   :  { %417 = vmatpush3.bf16.msra.mxu0 %v375_v34 }
  0x24   :  { %418 = vmatprep.subr.bf16.mxu0 %v540_v0 }
  0x25   :  { %437 = vmatpush3.bf16.msra.mxu1 %v384_v35 }
  0x26   :  { %438 = vmatprep.subr.bf16.mxu1 %v540_v0 }
  0x27   :  { %419 = vmatpush3.bf16.msra.mxu0 %v374_v40 }
  0x28   :  { %420 = vmatprep.subr.bf16.mxu0 %v540_v0  ;;  %v470_v59 = vpop.eup %469 }
  0x29   :  { %439 = vmatpush3.bf16.msra.mxu1 %v383_v41 }
  0x2a   :  { %440 = vmatprep.subr.bf16.mxu1 %v540_v0 }
  0x2b   :  { %421 = vmatpush3.bf16.msra.mxu0 %v373_v46 }
  0x2c   :  { %422 = vmatprep.subr.bf16.mxu0 %v540_v0 }
  0x2d   :  { %441 = vmatpush3.bf16.msra.mxu1 %v382_v47 }
  0x2e   :  { %442 = vmatprep.subr.bf16.mxu1 %v540_v0  ;;  %v332_v0 = vrot.slane %v470_v59, %v331_v58 }
  0x2f   :  { %423 = vmatpush3.bf16.msra.mxu0 %v372_v50 }
  0x31   :  { %443 = vmatpush3.bf16.msra.mxu1 %v381_v51 }
  0x32   :  { %425 = vmatmul.mubr.bf16.vlgmr.msra.gmra.mxu0 %v467_v52 }
  0x34   :  { %445 = vmatmul.mubr.bf16.vlgmr.msra.gmra.mxu1 %v468_v53 }
  0x8e   :  { %v316_v61 = vpop.permute.xlu0 %315 }
  0x92   :  { %v321_v6 = vpop.permute.xlu0 %320 }
  0xf2   :  { %v165_v62 = vpop.f32.mrf.mxu0 }
  0xf3   :  { %v305_v63 = vadd.f32 %v389_v60, %v165_v62 }
  0xf4   :  { %v426_v1 = vpop.f32.mrf.mxu0  ;;  %v282_v2 = vpop.f32.mrf.mxu1 }
  0xf5   :  { %307 = vst [vmem:[#allocation7] sm:$0xff] %v305_v63  ;;  %v323_v3 = vadd.f32 %v316_v61, %v282_v2 }
  0xf6   :  { %v168_v4 = vpop.f32.mrf.mxu0  ;;  %v446_v5 = vpop.f32.mrf.mxu1 }
  0xf7   :  { %v334_v7 = vadd.f32 %v332_v0, %v323_v3  ;;  %v306_v8 = vadd.f32 %v389_v60, %v168_v4 }
  0xf8   :  { %v427_v9 = vpop.f32.mrf.mxu0  ;;  %v285_v10 = vpop.f32.mrf.mxu1 }
  0xf9   :  { %336 = vst [vmem:[#allocation8] sm:$0xff] %v334_v7  ;;  %308 = vst [vmem:[#allocation7 + $0x8] sm:$0xff] %v306_v8  ;;  %v324_v11 = vadd.f32 %v321_v6, %v285_v10 }
  0xfa   :  { %v447_v12 = vpop.f32.mrf.mxu1 }
  0xfb   :  { %502 = shalt.err (!%p499_p9)
}
  0xfc   :  { %s545_s19 = smov 128   ;;  %s546_s20 = smov 8   ;;  %v335_v13 = vadd.f32 %v332_v0, %v324_v11 }
  0xfd   :  { %349 = dma.vmem_to_hbm [thread:$0]  %s344_s17, 256, %s638_s6, [#allocation6], %s545_s19, %s545_s19, %s546_s20  }
  0xfe   :  { %337 = vst [vmem:[#allocation8 + $0x8] sm:$0xff] %v335_v13  ;;  %s511_s23 = scalar_lea.vmem %s356_s4, 256  ;;  %p516_p11 = scmp.lt.s32.totalorder %s356_s4, %s356_s4 }
  0xff   :  { %p512_p10 = scmp.ne.s32.totalorder %s356_s4, %s511_s23  ;;  %p517_p12 = scmp.lt.s32.totalorder %s511_s23, %s511_s23 }
 0x101   :  { %p518_p13 = por %p517_p12, %p516_p11 }
 0x103   :  { %p519_p0 = pnand %p518_p13, %p512_p10 }
 0x105   :  { %522 = shalt.err (!%p519_p0)
}
 0x106   :  { %361 = dma.vmem_to_hbm [thread:$0]  %s356_s4, 256, %s639_s7, [#allocation9], %s545_s19, %s545_s19, %s546_s20  }
 0x107   :  { %533 = dma.done.wait [#allocation6], 256  }
 0x108   :  { %534 = vsyncadd [#allocation6], 4294967040 }
 0x109   :  { %535 = dma.done.wait [#allocation9], 256  }
 0x10a   :  { %536 = vsyncadd [#allocation9], 4294967040 }
 0x10b   :  { %368 = vsyncpa [#allocation5], 1 }
 0x10c   :  { %369 = vsyncpa [#allocation6], 1 }
 0x10d   :  { %370 = vsyncpa [#allocation9], 1 }

</bundles_post_ra>
